<compile_context>
chip_gen: v5e
topology: v5e:2x2
jax: 0.10.0
libtpu: 0.0.40
codegen_flags: <defaults>
</compile_context>

<pallas_src>
import jax
import jax.numpy as jnp
from jax import random
from jax.scipy.special import digamma, gammaln
from jax.experimental import pallas as pl
from jax.experimental.pallas import tpu as pltpu


# ---------------------------------------------------------------------------
# Fused forward kernel
# ---------------------------------------------------------------------------
def _make_fused_kernel(num_classes, num_views):
    C = num_classes
    V = num_views
    VC = V * C

    def kernel(x_ref, w1_ref, b1_ref, wed_ref, bed_ref, gexp_ref, fwg_ref,
               bg_ref, wt1_ref, bt1_ref, wt2_ref, bt2_ref, wr_ref, br_ref,
               rscale_ref, pa_ref, rl_ref):
        x = x_ref[...]

        # --- all ViewSpecificDNNs: one block-diagonal matmul ----------------
        z = jnp.maximum(
            jnp.dot(x, w1_ref[...], preferred_element_type=jnp.float32)
            + b1_ref[...], 0.0)

        # --- all EDN fcs (cols [:VC]) + degradation view_layers ([VC:]) -----
        ed = (jnp.dot(z, wed_ref[...], preferred_element_type=jnp.float32)
              + bed_ref[...])
        alpha = jnp.maximum(ed[:, :VC], 0.0) + 1.0          # (TB, V*C)
        dproj = ed[:, VC:]                                   # (TB, V*C)

        # --- per-view Dirichlet strength, broadcast over its C lanes via a
        #     block-ones matmul (no per-view slicing) ------------------------
        s_exp = jnp.dot(alpha, gexp_ref[...],
                        preferred_element_type=jnp.float32)  # (TB, V*C)
        r_exp = 1.0 - float(C) / s_exp                       # r_v repeated C x
        total_r = jnp.sum(r_exp, axis=-1, keepdims=True) * (1.0 / float(C))
        inv_tot = 1.0 / jnp.maximum(total_r, 1e-5)           # exact (amplified)
        weighted = r_exp * dproj

        # --- reliability fusion + global Linear fused (FWg = [I;...;I] @ Wg)
        h = (inv_tot
             * jnp.dot(weighted, fwg_ref[...], preferred_element_type=jnp.float32)
             + bg_ref[...])

        # --- TaskSpecificLayer + exact softmax ------------------------------
        t = jnp.maximum(
            jnp.dot(h, wt1_ref[...], preferred_element_type=jnp.float32)
            + bt1_ref[...], 0.0)
        logits = (jnp.dot(t, wt2_ref[...], preferred_element_type=jnp.float32)
                  + bt2_ref[...])
        m = jnp.max(logits, axis=-1, keepdims=True)
        ex = jnp.exp(logits - m)
        prob = ex / jnp.sum(ex, axis=-1, keepdims=True)

        # --- all reconstructions in one matmul; same column layout as z, so
        #     the beta-weighted MSE is a full-width elementwise reduce --------
        recon = (jnp.dot(h, wr_ref[...], preferred_element_type=jnp.float32)
                 + br_ref[...])
        diff = recon - z
        rl_ref[...] = jnp.sum(diff * diff * rscale_ref[...],
                              axis=-1, keepdims=True)        # (TB, 1)

        # --- lane-dense packed writeback [prob | alpha_0 .. alpha_{V-1}] ----
        pa_ref[:, :C] = prob
        pa_ref[:, C:] = alpha

    return kernel


def _block_diag(mats):
    rows = sum(m.shape[0] for m in mats)
    cols = sum(m.shape[1] for m in mats)
    out = jnp.zeros((rows, cols), jnp.float32)
    r = c = 0
    for m in mats:
        out = out.at[r:r + m.shape[0], c:c + m.shape[1]].set(m)
        r += m.shape[0]
        c += m.shape[1]
    return out


# ---------------------------------------------------------------------------
# Loss helpers (plain JAX — digamma/lgamma have no Mosaic lowering)
# ---------------------------------------------------------------------------
def KL_jax(alpha):
    C = alpha.shape[-1]
    sum_alpha = jnp.sum(alpha, axis=1, keepdims=True)
    first = (gammaln(sum_alpha)
             - jnp.sum(gammaln(alpha), axis=1, keepdims=True)
             + 0.0                                  # sum of lgamma(1) over C
             - gammaln(jnp.asarray(float(C))))      # lgamma(sum(ones)) = lgamma(C)
    second = jnp.sum((alpha - 1.0) * (digamma(alpha) - digamma(sum_alpha)),
                     axis=1, keepdims=True)
    return (first + second).reshape(-1)


def loss_digamma_jax(alpha, labels, kl_penalty, num_classes):
    y = jax.nn.one_hot(labels, num_classes, dtype=alpha.dtype)
    log_likelihood = jnp.sum(
        y * (digamma(jnp.sum(alpha, axis=-1, keepdims=True)) - digamma(alpha)),
        axis=-1)
    return log_likelihood + kl_penalty * KL_jax((alpha - 1.0) * (1.0 - y) + 1.0)


# ---------------------------------------------------------------------------
# TMF model (parameter setup + glue in plain JAX, hot path in one Pallas call)
# ---------------------------------------------------------------------------
class TMFPallas:
    def __init__(self, key, sample_shapes, num_classes, annealing=20,
                 tile_batch=None):
        assert len(sample_shapes[0]) == 1, "vector views only in this port"
        self.annealing = annealing
        self.num_views = len(sample_shapes)
        self.classes = num_classes
        self.d_list = [int(s[0]) for s in sample_shapes]
        self.tile_batch = tile_batch
        self._slab_cache = {}
        self._call_cache = {}
        C = num_classes

        def lin(k, fan_in, fan_out):
            k1, k2 = random.split(k)
            bound = 1.0 / float(fan_in) ** 0.5
            w = random.uniform(k1, (fan_in, fan_out), jnp.float32, -bound, bound)
            b = random.uniform(k2, (1, fan_out), jnp.float32, -bound, bound)
            return w, b

        prng = random.split(key, 4 * self.num_views + 3)
        ki = iter(range(len(prng)))
        self.w1, self.b1 = [], []
        self.we, self.be = [], []
        self.wd, self.bd = [], []
        self.wr, self.br = [], []
        for shape in sample_shapes:
            D = shape[0]
            fc_dim = min(D, 500)                      # ViewSpecificDNN fc width
            # The reference applies the degradation view_layer (fan_in = D) to
            # z whose width is fc_dim; this only type-checks when D <= 500.
            assert fc_dim == D, "reference requires D <= 500 for vector views"
            w1, b1 = lin(prng[next(ki)], D, fc_dim)   # DNN fc
            we, be = lin(prng[next(ki)], fc_dim, C)   # EDN fc
            wd, bd = lin(prng[next(ki)], D, C)        # Degradation view_layer
            wr, br = lin(prng[next(ki)], C, D)        # Degradation reconstruction
            self.w1.append(w1); self.b1.append(b1)
            self.we.append(we); self.be.append(be)
            self.wd.append(wd); self.bd.append(bd)
            self.wr.append(wr); self.br.append(br)
        self.wg, self.bg = lin(prng[next(ki)], C, C)       # global_layer
        self.wt1, self.bt1 = lin(prng[next(ki)], C, 100)   # task fc1
        self.wt2, self.bt2 = lin(prng[next(ki)], 100, C)   # task fc2

    # ------------------------------------------------------------------
    def _slabs(self, view_keys):
        ck = tuple(view_keys)
        s = self._slab_cache.get(ck)
        if s is not None:
            return s
        C = self.classes
        V = len(view_keys)
        d_list = [self.d_list[k] for k in view_keys]
        w1_bd = _block_diag([self.w1[k] for k in view_keys])            # (ΣD, ΣD)
        b1_cat = jnp.concatenate([self.b1[k] for k in view_keys], axis=1)
        we_bd = _block_diag([self.we[k] for k in view_keys])            # (ΣD, VC)
        wd_bd = _block_diag([self.wd[k] for k in view_keys])            # (ΣD, VC)
        wed_bd = jnp.concatenate([we_bd, wd_bd], axis=1)                # (ΣD, 2VC)
        be_cat = jnp.concatenate([self.be[k] for k in view_keys], axis=1)
        bd_cat = jnp.concatenate([self.bd[k] for k in view_keys], axis=1)
        bed_cat = jnp.concatenate([be_cat, bd_cat], axis=1)             # (1, 2VC)
        gexp = _block_diag([jnp.ones((C, C), jnp.float32)] * V)         # (VC, VC)
        fwg = jnp.tile(self.wg, (V, 1))                                 # (VC, C)
        wr_cat = jnp.concatenate([self.wr[k] for k in view_keys], axis=1)  # (C, ΣD)
        br_cat = jnp.concatenate([self.br[k] for k in view_keys], axis=1)  # (1, ΣD)
        s = dict(d_list=d_list, w1_bd=w1_bd, b1_cat=b1_cat, wed_bd=wed_bd,
                 bed_cat=bed_cat, gexp=gexp, fwg=fwg, wr_cat=wr_cat,
                 br_cat=br_cat)
        self._slab_cache[ck] = s
        return s

    # ------------------------------------------------------------------
    def _tile(self, B):
        B8 = ((B + 7) // 8) * 8
        if self.tile_batch is not None:
            TB = max(8, (int(self.tile_batch) // 8) * 8)
        else:
            TB = min(256, B8)          # conservative for v7x 32 MiB scoped VMEM
        B_pad = ((B8 + TB - 1) // TB) * TB
        return B_pad, TB

    # ------------------------------------------------------------------
    def _get_call(self, view_keys, B_pad, TB):
        ck = (tuple(view_keys), B_pad, TB)
        fn = self._call_cache.get(ck)
        if fn is not None:
            return fn
        C = self.classes
        V = len(view_keys)
        VC = V * C
        sumD = sum(self.d_list[k] for k in view_keys)
        kern = _make_fused_kernel(C, V)

        def resident(shape):
            return pl.BlockSpec(shape, lambda i: (0, 0))

        in_specs = [
            pl.BlockSpec((TB, sumD), lambda i: (i, 0)),   # x_cat (batch tiled)
            resident((sumD, sumD)),                       # W1 block-diag
            resident((1, sumD)),                          # b1 concat
            resident((sumD, 2 * VC)),                     # [We | Wd] block-diag
            resident((1, 2 * VC)),                        # [be | bd]
            resident((VC, VC)),                           # block-ones expander
            resident((VC, C)),                            # FWg = tile(Wg, V)
            resident((1, C)),                             # bg
            resident((C, 100)),                           # task fc1 W
            resident((1, 100)),                           # task fc1 b
            resident((100, C)),                           # task fc2 W
            resident((1, C)),                             # task fc2 b
            resident((C, sumD)),                          # reconstruction W cat
            resident((1, sumD)),                          # reconstruction b cat
            resident((1, sumD)),                          # beta/(B*d) lane scale
        ]
        out_specs = (
            pl.BlockSpec((TB, (V + 1) * C), lambda i: (i, 0)),   # [prob|alphas]
            pl.BlockSpec((TB, 1), lambda i: (i, 0)),             # recon row loss
        )
        out_shape = (
            jax.ShapeDtypeStruct((B_pad, (V + 1) * C), jnp.float32),
            jax.ShapeDtypeStruct((B_pad, 1), jnp.float32),
        )
        flops = 2 * B_pad * (sumD * sumD + sumD * 2 * VC + VC * VC + VC * C
                             + C * 100 + 100 * C + C * sumD)
        weight_bytes = 4 * (sumD * sumD + sumD + sumD * 2 * VC + 2 * VC
                            + VC * VC + VC * C + C + C * 100 + 100 + 100 * C
                            + C + C * sumD + sumD + sumD)
        bytes_accessed = 4 * (B_pad * sumD + B_pad * ((V + 1) * C + 1)) \
            + weight_bytes
        fn = pl.pallas_call(
            kern,
            grid=(B_pad // TB,),
            in_specs=in_specs,
            out_specs=out_specs,
            out_shape=out_shape,
            compiler_params=pltpu.CompilerParams(
                dimension_semantics=("parallel",),
                vmem_limit_bytes=32 * 1024 * 1024),
            cost_estimate=pl.CostEstimate(
                flops=flops, transcendentals=B_pad * C,
                bytes_accessed=bytes_accessed),
        )
        self._call_cache[ck] = fn
        return fn

    # ------------------------------------------------------------------
    def forward(self, x, target=None, epoch=0):
        C = self.classes
        view_keys = list(x.keys())
        V = len(view_keys)
        B = int(x[view_keys[0]].shape[0])

        s = self._slabs(view_keys)
        d_list = s["d_list"]

        # beta follows the reference's dict-key iteration: beta_k = k^2/sum(k^2)
        denom = sum(k * k for k in view_keys)
        beta = {k: (float(k * k) / denom if denom > 0 else 0.0)
                for k in view_keys}
        rscale = jnp.concatenate(
            [jnp.full((1, d), beta[k] / float(B * d), jnp.float32)
             for k, d in zip(view_keys, d_list)], axis=1)

        x_cat = jnp.concatenate(
            [x[k].astype(jnp.float32) for k in view_keys], axis=1)
        B_pad, TB = self._tile(B)
        if B_pad != B:
            x_cat = jnp.pad(x_cat, ((0, B_pad - B), (0, 0)))

        fn = self._get_call(view_keys, B_pad, TB)
        packed, rrow = fn(x_cat, s["w1_bd"], s["b1_cat"], s["wed_bd"],
                          s["bed_cat"], s["gexp"], s["fwg"], self.bg,
                          self.wt1, self.bt1, self.wt2, self.bt2,
                          s["wr_cat"], s["br_cat"], rscale)

        prob = packed[:B, :C]
        alphas = {view_keys[v]: packed[:B, C + v * C: C + (v + 1) * C]
                  for v in range(V)}
        recon_loss = jnp.sum(rrow[:B, 0])      # padded rows excluded

        total = 0.0
        if target is not None:
            # F.cross_entropy treats `probability` as logits (re-softmaxes it)
            logp = jax.nn.log_softmax(prob, axis=1)
            total = -jnp.mean(jnp.take_along_axis(logp, target[:, None], axis=1))
        total = total + 1.0 * recon_loss
        if target is not None:
            kl_pen = min(1.0, epoch / self.annealing)
            evid = 0.0
            for k in view_keys:
                evid = evid + loss_digamma_jax(alphas[k], target, kl_pen, C)
            total = total + 1.0 * evid
        return {"probability": prob, "loss": total}


# ---------------------------------------------------------------------------
if __name__ == "__main__":
    key = random.PRNGKey(0)
    B = 16
    sample_shapes = [(32,), (24,)]
    num_classes = 4

    k_model, k_x0, k_x1, k_t = random.split(key, 4)
    # tile_batch=8 -> grid=(2,) exercises the batch pipeline / parallel axis.
    model = TMFPallas(k_model, sample_shapes, num_classes, annealing=20,
                      tile_batch=8)

    x = {0: random.normal(k_x0, (B, sample_shapes[0][0]), jnp.float32),
         1: random.normal(k_x1, (B, sample_shapes[1][0]), jnp.float32)}
    target = random.randint(k_t, (B,), 0, num_classes)

    out = model.forward(x, target=target, epoch=5)
    out = jax.block_until_ready(out)

    assert out["probability"].shape == (B, num_classes)
    assert out["loss"].shape == (B,)
    assert bool(jnp.all(jnp.isfinite(out["probability"])))
    assert bool(jnp.all(jnp.isfinite(out["loss"])))
    # exact softmax normalization (no approximate reciprocal on the denom)
    assert bool(jnp.all(jnp.abs(jnp.sum(out["probability"], axis=1) - 1.0) < 1e-5))
    print("KERNEL_OK")
</pallas_src>

<mosaic_0001>
module attributes {stable_mosaic.version = 11 : i64} {
  func.func @kernel(%arg0: i32, %arg1: memref<8x56xf32, #tpu.memory_space<vmem>>, %arg2: memref<56x56xf32, #tpu.memory_space<vmem>>, %arg3: memref<1x56xf32, #tpu.memory_space<vmem>>, %arg4: memref<56x16xf32, #tpu.memory_space<vmem>>, %arg5: memref<1x16xf32, #tpu.memory_space<vmem>>, %arg6: memref<8x8xf32, #tpu.memory_space<vmem>>, %arg7: memref<8x4xf32, #tpu.memory_space<vmem>>, %arg8: memref<1x4xf32, #tpu.memory_space<vmem>>, %arg9: memref<4x100xf32, #tpu.memory_space<vmem>>, %arg10: memref<1x100xf32, #tpu.memory_space<vmem>>, %arg11: memref<100x4xf32, #tpu.memory_space<vmem>>, %arg12: memref<1x4xf32, #tpu.memory_space<vmem>>, %arg13: memref<4x56xf32, #tpu.memory_space<vmem>>, %arg14: memref<1x56xf32, #tpu.memory_space<vmem>>, %arg15: memref<1x56xf32, #tpu.memory_space<vmem>>, %arg16: memref<8x12xf32, #tpu.memory_space<vmem>>, %arg17: memref<8x1xf32, #tpu.memory_space<vmem>>) attributes {dimension_semantics = [#tpu.dimension_semantics<parallel>], iteration_bounds = array<i64: 2>, scalar_prefetch = 0 : i64, scratch_operands = 0 : i64, tpu.core_type = #tpu.core_type<tc>, window_params = [{transform_indices = @transform_0, window_bounds = array<i64: 8, 56>}, {pipeline_mode = #tpu.pipeline_mode<synchronous>, transform_indices = @transform_1, window_bounds = array<i64: 56, 56>}, {pipeline_mode = #tpu.pipeline_mode<synchronous>, transform_indices = @transform_2, window_bounds = array<i64: 1, 56>}, {pipeline_mode = #tpu.pipeline_mode<synchronous>, transform_indices = @transform_3, window_bounds = array<i64: 56, 16>}, {pipeline_mode = #tpu.pipeline_mode<synchronous>, transform_indices = @transform_4, window_bounds = array<i64: 1, 16>}, {pipeline_mode = #tpu.pipeline_mode<synchronous>, transform_indices = @transform_5, window_bounds = array<i64: 8, 8>}, {pipeline_mode = #tpu.pipeline_mode<synchronous>, transform_indices = @transform_6, window_bounds = array<i64: 8, 4>}, {pipeline_mode = #tpu.pipeline_mode<synchronous>, transform_indices = @transform_7, window_bounds = array<i64: 1, 4>}, {pipeline_mode = #tpu.pipeline_mode<synchronous>, transform_indices = @transform_8, window_bounds = array<i64: 4, 100>}, {pipeline_mode = #tpu.pipeline_mode<synchronous>, transform_indices = @transform_9, window_bounds = array<i64: 1, 100>}, {pipeline_mode = #tpu.pipeline_mode<synchronous>, transform_indices = @transform_10, window_bounds = array<i64: 100, 4>}, {pipeline_mode = #tpu.pipeline_mode<synchronous>, transform_indices = @transform_11, window_bounds = array<i64: 1, 4>}, {pipeline_mode = #tpu.pipeline_mode<synchronous>, transform_indices = @transform_12, window_bounds = array<i64: 4, 56>}, {pipeline_mode = #tpu.pipeline_mode<synchronous>, transform_indices = @transform_13, window_bounds = array<i64: 1, 56>}, {pipeline_mode = #tpu.pipeline_mode<synchronous>, transform_indices = @transform_14, window_bounds = array<i64: 1, 56>}, {transform_indices = @transform_15, window_bounds = array<i64: 8, 12>}, {transform_indices = @transform_16, window_bounds = array<i64: 8, 1>}]} {
    %c0 = arith.constant 0 : index
    %c0_0 = arith.constant 0 : index
    %0 = vector.load %arg1[%c0, %c0_0] : memref<8x56xf32, #tpu.memory_space<vmem>>, vector<8x56xf32>
    %c0_1 = arith.constant 0 : index
    %c0_2 = arith.constant 0 : index
    %1 = vector.load %arg2[%c0_1, %c0_2] : memref<56x56xf32, #tpu.memory_space<vmem>>, vector<56x56xf32>
    %cst = arith.constant dense<0.000000e+00> : vector<8x56xf32>
    %2 = tpu.matmul %0, %1, %cst {dimension_numbers = #tpu.dot_dimension_numbers<[1], [0], [0], [1], [0, 0, 1, 1], [], []>} : vector<8x56xf32>, vector<56x56xf32>, vector<8x56xf32> -> vector<8x56xf32>
    %c0_3 = arith.constant 0 : index
    %c0_4 = arith.constant 0 : index
    %3 = vector.load %arg3[%c0_3, %c0_4] : memref<1x56xf32, #tpu.memory_space<vmem>>, vector<1x56xf32>
    %4 = vector.broadcast %3 : vector<1x56xf32> to vector<8x56xf32>
    %5 = arith.addf %2, %4 : vector<8x56xf32>
    %cst_5 = arith.constant 0.000000e+00 : f32
    %6 = vector.broadcast %cst_5 : f32 to vector<8x56xf32>
    %7 = arith.maximumf %5, %6 : vector<8x56xf32>
    %c0_6 = arith.constant 0 : index
    %c0_7 = arith.constant 0 : index
    %8 = vector.load %arg4[%c0_6, %c0_7] : memref<56x16xf32, #tpu.memory_space<vmem>>, vector<56x16xf32>
    %cst_8 = arith.constant dense<0.000000e+00> : vector<8x16xf32>
    %9 = tpu.matmul %7, %8, %cst_8 {dimension_numbers = #tpu.dot_dimension_numbers<[1], [0], [0], [1], [0, 0, 1, 1], [], []>} : vector<8x56xf32>, vector<56x16xf32>, vector<8x16xf32> -> vector<8x16xf32>
    %c0_9 = arith.constant 0 : index
    %c0_10 = arith.constant 0 : index
    %10 = vector.load %arg5[%c0_9, %c0_10] : memref<1x16xf32, #tpu.memory_space<vmem>>, vector<1x16xf32>
    %11 = vector.broadcast %10 : vector<1x16xf32> to vector<8x16xf32>
    %12 = arith.addf %9, %11 : vector<8x16xf32>
    %13 = vector.extract_strided_slice %12 {offsets = [0, 0], sizes = [8, 8], strides = [1, 1]} : vector<8x16xf32> to vector<8x8xf32>
    %cst_11 = arith.constant 0.000000e+00 : f32
    %14 = vector.broadcast %cst_11 : f32 to vector<8x8xf32>
    %15 = arith.maximumf %13, %14 : vector<8x8xf32>
    %cst_12 = arith.constant 1.000000e+00 : f32
    %16 = vector.broadcast %cst_12 : f32 to vector<8x8xf32>
    %17 = arith.addf %15, %16 : vector<8x8xf32>
    %18 = vector.extract_strided_slice %12 {offsets = [0, 8], sizes = [8, 8], strides = [1, 1]} : vector<8x16xf32> to vector<8x8xf32>
    %c0_13 = arith.constant 0 : index
    %c0_14 = arith.constant 0 : index
    %19 = vector.load %arg6[%c0_13, %c0_14] : memref<8x8xf32, #tpu.memory_space<vmem>>, vector<8x8xf32>
    %cst_15 = arith.constant dense<0.000000e+00> : vector<8x8xf32>
    %20 = tpu.matmul %17, %19, %cst_15 {dimension_numbers = #tpu.dot_dimension_numbers<[1], [0], [0], [1], [0, 0, 1, 1], [], []>} : vector<8x8xf32>, vector<8x8xf32>, vector<8x8xf32> -> vector<8x8xf32>
    %cst_16 = arith.constant 4.000000e+00 : f32
    %21 = vector.broadcast %cst_16 : f32 to vector<8x8xf32>
    %22 = arith.divf %21, %20 : vector<8x8xf32>
    %cst_17 = arith.constant 1.000000e+00 : f32
    %23 = vector.broadcast %cst_17 : f32 to vector<8x8xf32>
    %24 = arith.subf %23, %22 : vector<8x8xf32>
    %cst_18 = arith.constant dense<0.000000e+00> : vector<8xf32>
    %25 = vector.multi_reduction <add>, %24, %cst_18 [1] : vector<8x8xf32> to vector<8xf32>
    %26 = vector.shape_cast %25 : vector<8xf32> to vector<8x1xf32>
    %cst_19 = arith.constant 2.500000e-01 : f32
    %27 = vector.broadcast %cst_19 : f32 to vector<8x1xf32>
    %28 = arith.mulf %26, %27 : vector<8x1xf32>
    %cst_20 = arith.constant 9.99999974E-6 : f32
    %29 = vector.broadcast %cst_20 : f32 to vector<8x1xf32>
    %30 = arith.maximumf %28, %29 : vector<8x1xf32>
    %cst_21 = arith.constant 1.000000e+00 : f32
    %31 = vector.broadcast %cst_21 : f32 to vector<8x1xf32>
    %32 = arith.divf %31, %30 : vector<8x1xf32>
    %33 = arith.mulf %24, %18 : vector<8x8xf32>
    %c0_22 = arith.constant 0 : index
    %c0_23 = arith.constant 0 : index
    %34 = vector.load %arg7[%c0_22, %c0_23] : memref<8x4xf32, #tpu.memory_space<vmem>>, vector<8x4xf32>
    %cst_24 = arith.constant dense<0.000000e+00> : vector<8x4xf32>
    %35 = tpu.matmul %33, %34, %cst_24 {dimension_numbers = #tpu.dot_dimension_numbers<[1], [0], [0], [1], [0, 0, 1, 1], [], []>} : vector<8x8xf32>, vector<8x4xf32>, vector<8x4xf32> -> vector<8x4xf32>
    %36 = vector.broadcast %32 : vector<8x1xf32> to vector<8x4xf32>
    %37 = arith.mulf %36, %35 : vector<8x4xf32>
    %c0_25 = arith.constant 0 : index
    %c0_26 = arith.constant 0 : index
    %38 = vector.load %arg8[%c0_25, %c0_26] : memref<1x4xf32, #tpu.memory_space<vmem>>, vector<1x4xf32>
    %39 = vector.broadcast %38 : vector<1x4xf32> to vector<8x4xf32>
    %40 = arith.addf %37, %39 : vector<8x4xf32>
    %c0_27 = arith.constant 0 : index
    %c0_28 = arith.constant 0 : index
    %41 = vector.load %arg9[%c0_27, %c0_28] : memref<4x100xf32, #tpu.memory_space<vmem>>, vector<4x100xf32>
    %cst_29 = arith.constant dense<0.000000e+00> : vector<8x100xf32>
    %42 = tpu.matmul %40, %41, %cst_29 {dimension_numbers = #tpu.dot_dimension_numbers<[1], [0], [0], [1], [0, 0, 1, 1], [], []>} : vector<8x4xf32>, vector<4x100xf32>, vector<8x100xf32> -> vector<8x100xf32>
    %c0_30 = arith.constant 0 : index
    %c0_31 = arith.constant 0 : index
    %43 = vector.load %arg10[%c0_30, %c0_31] : memref<1x100xf32, #tpu.memory_space<vmem>>, vector<1x100xf32>
    %44 = vector.broadcast %43 : vector<1x100xf32> to vector<8x100xf32>
    %45 = arith.addf %42, %44 : vector<8x100xf32>
    %cst_32 = arith.constant 0.000000e+00 : f32
    %46 = vector.broadcast %cst_32 : f32 to vector<8x100xf32>
    %47 = arith.maximumf %45, %46 : vector<8x100xf32>
    %c0_33 = arith.constant 0 : index
    %c0_34 = arith.constant 0 : index
    %48 = vector.load %arg11[%c0_33, %c0_34] : memref<100x4xf32, #tpu.memory_space<vmem>>, vector<100x4xf32>
    %cst_35 = arith.constant dense<0.000000e+00> : vector<8x4xf32>
    %49 = tpu.matmul %47, %48, %cst_35 {dimension_numbers = #tpu.dot_dimension_numbers<[1], [0], [0], [1], [0, 0, 1, 1], [], []>} : vector<8x100xf32>, vector<100x4xf32>, vector<8x4xf32> -> vector<8x4xf32>
    %c0_36 = arith.constant 0 : index
    %c0_37 = arith.constant 0 : index
    %50 = vector.load %arg12[%c0_36, %c0_37] : memref<1x4xf32, #tpu.memory_space<vmem>>, vector<1x4xf32>
    %51 = vector.broadcast %50 : vector<1x4xf32> to vector<8x4xf32>
    %52 = arith.addf %49, %51 : vector<8x4xf32>
    %cst_38 = arith.constant dense<0xFF800000> : vector<8xf32>
    %53 = vector.multi_reduction <maximumf>, %52, %cst_38 [1] : vector<8x4xf32> to vector<8xf32>
    %54 = vector.shape_cast %53 : vector<8xf32> to vector<8x1xf32>
    %55 = vector.broadcast %54 : vector<8x1xf32> to vector<8x4xf32>
    %56 = arith.subf %52, %55 : vector<8x4xf32>
    %57 = math.exp %56 : vector<8x4xf32>
    %cst_39 = arith.constant dense<0.000000e+00> : vector<8xf32>
    %58 = vector.multi_reduction <add>, %57, %cst_39 [1] : vector<8x4xf32> to vector<8xf32>
    %59 = vector.shape_cast %58 : vector<8xf32> to vector<8x1xf32>
    %60 = vector.broadcast %59 : vector<8x1xf32> to vector<8x4xf32>
    %61 = arith.divf %57, %60 : vector<8x4xf32>
    %c0_40 = arith.constant 0 : index
    %c0_41 = arith.constant 0 : index
    %62 = vector.load %arg13[%c0_40, %c0_41] : memref<4x56xf32, #tpu.memory_space<vmem>>, vector<4x56xf32>
    %cst_42 = arith.constant dense<0.000000e+00> : vector<8x56xf32>
    %63 = tpu.matmul %40, %62, %cst_42 {dimension_numbers = #tpu.dot_dimension_numbers<[1], [0], [0], [1], [0, 0, 1, 1], [], []>} : vector<8x4xf32>, vector<4x56xf32>, vector<8x56xf32> -> vector<8x56xf32>
    %c0_43 = arith.constant 0 : index
    %c0_44 = arith.constant 0 : index
    %64 = vector.load %arg14[%c0_43, %c0_44] : memref<1x56xf32, #tpu.memory_space<vmem>>, vector<1x56xf32>
    %65 = vector.broadcast %64 : vector<1x56xf32> to vector<8x56xf32>
    %66 = arith.addf %63, %65 : vector<8x56xf32>
    %67 = arith.subf %66, %7 : vector<8x56xf32>
    %68 = arith.mulf %67, %67 : vector<8x56xf32>
    %c0_45 = arith.constant 0 : index
    %c0_46 = arith.constant 0 : index
    %69 = vector.load %arg15[%c0_45, %c0_46] : memref<1x56xf32, #tpu.memory_space<vmem>>, vector<1x56xf32>
    %70 = vector.broadcast %69 : vector<1x56xf32> to vector<8x56xf32>
    %71 = arith.mulf %68, %70 : vector<8x56xf32>
    %cst_47 = arith.constant dense<0.000000e+00> : vector<8xf32>
    %72 = vector.multi_reduction <add>, %71, %cst_47 [1] : vector<8x56xf32> to vector<8xf32>
    %73 = vector.shape_cast %72 : vector<8xf32> to vector<8x1xf32>
    %c0_48 = arith.constant 0 : index
    %c0_49 = arith.constant 0 : index
    %74 = vector.load %arg17[%c0_48, %c0_49] : memref<8x1xf32, #tpu.memory_space<vmem>>, vector<8x1xf32>
    tpu.vector_store %arg17[%c0_48, %c0_49], %73 {strides = array<i32>} : memref<8x1xf32, #tpu.memory_space<vmem>>, vector<8x1xf32>,
    %c0_50 = arith.constant 0 : index
    %c0_51 = arith.constant 0 : index
    %75 = vector.load %arg16[%c0_50, %c0_51] : memref<8x12xf32, #tpu.memory_space<vmem>>, vector<8x4xf32>
    tpu.vector_store %arg16[%c0_50, %c0_51], %61 {strides = array<i32>} : memref<8x12xf32, #tpu.memory_space<vmem>>, vector<8x4xf32>,
    %c0_52 = arith.constant 0 : index
    %c4 = arith.constant 4 : index
    %76 = vector.load %arg16[%c0_52, %c4] : memref<8x12xf32, #tpu.memory_space<vmem>>, vector<8x8xf32>
    tpu.vector_store %arg16[%c0_52, %c4], %17 {strides = array<i32>} : memref<8x12xf32, #tpu.memory_space<vmem>>, vector<8x8xf32>,
    return
  }
  func.func @transform_0(%arg0: i32) -> (i32, i32) {
    %c0_i32 = arith.constant 0 : i32
    %c0_i32_0 = arith.constant 0 : i32
    return %arg0, %c0_i32 : i32, i32
  }
  func.func @transform_1(%arg0: i32) -> (i32, i32) {
    %c0_i32 = arith.constant 0 : i32
    %c0_i32_0 = arith.constant 0 : i32
    %c0_i32_1 = arith.constant 0 : i32
    return %c0_i32, %c0_i32_0 : i32, i32
  }
  func.func @transform_2(%arg0: i32) -> (i32, i32) {
    %c0_i32 = arith.constant 0 : i32
    %c0_i32_0 = arith.constant 0 : i32
    %c0_i32_1 = arith.constant 0 : i32
    return %c0_i32, %c0_i32_0 : i32, i32
  }
  func.func @transform_3(%arg0: i32) -> (i32, i32) {
    %c0_i32 = arith.constant 0 : i32
    %c0_i32_0 = arith.constant 0 : i32
    %c0_i32_1 = arith.constant 0 : i32
    return %c0_i32, %c0_i32_0 : i32, i32
  }
  func.func @transform_4(%arg0: i32) -> (i32, i32) {
    %c0_i32 = arith.constant 0 : i32
    %c0_i32_0 = arith.constant 0 : i32
    %c0_i32_1 = arith.constant 0 : i32
    return %c0_i32, %c0_i32_0 : i32, i32
  }
  func.func @transform_5(%arg0: i32) -> (i32, i32) {
    %c0_i32 = arith.constant 0 : i32
    %c0_i32_0 = arith.constant 0 : i32
    %c0_i32_1 = arith.constant 0 : i32
    return %c0_i32, %c0_i32_0 : i32, i32
  }
  func.func @transform_6(%arg0: i32) -> (i32, i32) {
    %c0_i32 = arith.constant 0 : i32
    %c0_i32_0 = arith.constant 0 : i32
    %c0_i32_1 = arith.constant 0 : i32
    return %c0_i32, %c0_i32_0 : i32, i32
  }
  func.func @transform_7(%arg0: i32) -> (i32, i32) {
    %c0_i32 = arith.constant 0 : i32
    %c0_i32_0 = arith.constant 0 : i32
    %c0_i32_1 = arith.constant 0 : i32
    return %c0_i32, %c0_i32_0 : i32, i32
  }
  func.func @transform_8(%arg0: i32) -> (i32, i32) {
    %c0_i32 = arith.constant 0 : i32
    %c0_i32_0 = arith.constant 0 : i32
    %c0_i32_1 = arith.constant 0 : i32
    return %c0_i32, %c0_i32_0 : i32, i32
  }
  func.func @transform_9(%arg0: i32) -> (i32, i32) {
    %c0_i32 = arith.constant 0 : i32
    %c0_i32_0 = arith.constant 0 : i32
    %c0_i32_1 = arith.constant 0 : i32
    return %c0_i32, %c0_i32_0 : i32, i32
  }
  func.func @transform_10(%arg0: i32) -> (i32, i32) {
    %c0_i32 = arith.constant 0 : i32
    %c0_i32_0 = arith.constant 0 : i32
    %c0_i32_1 = arith.constant 0 : i32
    return %c0_i32, %c0_i32_0 : i32, i32
  }
  func.func @transform_11(%arg0: i32) -> (i32, i32) {
    %c0_i32 = arith.constant 0 : i32
    %c0_i32_0 = arith.constant 0 : i32
    %c0_i32_1 = arith.constant 0 : i32
    return %c0_i32, %c0_i32_0 : i32, i32
  }
  func.func @transform_12(%arg0: i32) -> (i32, i32) {
    %c0_i32 = arith.constant 0 : i32
    %c0_i32_0 = arith.constant 0 : i32
    %c0_i32_1 = arith.constant 0 : i32
    return %c0_i32, %c0_i32_0 : i32, i32
  }
  func.func @transform_13(%arg0: i32) -> (i32, i32) {
    %c0_i32 = arith.constant 0 : i32
    %c0_i32_0 = arith.constant 0 : i32
    %c0_i32_1 = arith.constant 0 : i32
    return %c0_i32, %c0_i32_0 : i32, i32
  }
  func.func @transform_14(%arg0: i32) -> (i32, i32) {
    %c0_i32 = arith.constant 0 : i32
    %c0_i32_0 = arith.constant 0 : i32
    %c0_i32_1 = arith.constant 0 : i32
    return %c0_i32, %c0_i32_0 : i32, i32
  }
  func.func @transform_15(%arg0: i32) -> (i32, i32) {
    %c0_i32 = arith.constant 0 : i32
    %c0_i32_0 = arith.constant 0 : i32
    return %arg0, %c0_i32 : i32, i32
  }
  func.func @transform_16(%arg0: i32) -> (i32, i32) {
    %c0_i32 = arith.constant 0 : i32
    %c0_i32_0 = arith.constant 0 : i32
    return %arg0, %c0_i32 : i32, i32
  }
}

</mosaic_0001>

<bundles_post_ra>
// kernel: tpu_custom_call.1
= control target key start
LH: loop header
LB: loop body
LE: loop exit
PB: predicated region body
PF: predicated region fallthrough
CT: control target
= control target key end

     0   :  { %s1410_s0 = inlined_call_operand.vmem [shape: f32[16,56], index: 0, kind: input, shape index: {}]   ;;  %s1411_s1 = inlined_call_operand.vmem [shape: f32[56,56], index: 1, kind: input, shape index: {}]   ;;  %s1412_s2 = inlined_call_operand.vmem [shape: f32[1,56], index: 2, kind: input, shape index: {}]   ;;  %s1413_s3 = inlined_call_operand.vmem [shape: f32[56,16], index: 3, kind: input, shape index: {}]   ;;  %s1414_s4 = inlined_call_operand.vmem [shape: f32[1,16], index: 4, kind: input, shape index: {}]   ;;  %s1415_s5 = inlined_call_operand.vmem [shape: f32[8,8], index: 5, kind: input, shape index: {}]   ;;  %s1416_s6 = inlined_call_operand.vmem [shape: f32[8,4], index: 6, kind: input, shape index: {}]   ;;  %s1417_s7 = inlined_call_operand.vmem [shape: f32[1,4], index: 7, kind: input, shape index: {}]   ;;  %s1418_s8 = inlined_call_operand.vmem [shape: f32[4,100], index: 8, kind: input, shape index: {}]   ;;  %s1419_s9 = inlined_call_operand.vmem [shape: f32[1,100], index: 9, kind: input, shape index: {}]   ;;  %s1420_s10 = inlined_call_operand.vmem [shape: f32[100,4], index: 10, kind: input, shape index: {}]   ;;  %s1421_s11 = inlined_call_operand.vmem [shape: f32[1,4], index: 11, kind: input, shape index: {}]   ;;  %s1422_s12 = inlined_call_operand.vmem [shape: f32[4,56], index: 12, kind: input, shape index: {}]   ;;  %s1423_s13 = inlined_call_operand.vmem [shape: f32[1,56], index: 13, kind: input, shape index: {}]   ;;  %s1424_s14 = inlined_call_operand.vmem [shape: f32[1,56], index: 14, kind: input, shape index: {}]   ;;  %s1425_s15 = inlined_call_operand.hbm [shape: f32[16,12], index: 15, kind: output, shape index: {0}]   ;;  %s1426_s16 = inlined_call_operand.vmem [shape: f32[16,1], index: 16, kind: output, shape index: {1}]  }
   0x1   :  { %1433 = sst [smem:[#allocation11_spill]] %s1410_s0 }
   0x2   :  { %1434 = sst [smem:[#allocation12_spill]] %s1411_s1 }
   0x3   :  { %22 = vsyncpa [#allocation3], 0 }
   0x4   :  { %24 = vsyncpa [#allocation3 + $0x1], 0  ;;  %s1179_s21 = smov 0   ;;  %s1181_s22 = smov 0  }
   0x5   :  { %s1183_s23 = smov 0   ;;  %s1185_s24 = smov 0  }
   0x6 LB: > { %1435 = sst [smem:[#allocation5_spill]] %s1078_s21  ;;  %s1200_s25 = sadd.s32 4294967295, %s1090_s24   ;;  %s1090_s24 = sphi %s1185_s24, %s1448_s24   ;;  %s1086_s23 = sphi %s1183_s23, %s1450_s23   ;;  %s1082_s22 = sphi %s1181_s22, %s1452_s22   ;;  %s1078_s21 = sphi %s1179_s21, %s1451_s21  }
   0x7   : > { %1436 = sst [smem:[#allocation6_spill]] %s1086_s23  ;;  %s951_s26 = sadd.s32 4294967294, %s1090_s24  }
   0x8   : > { %1437 = sst [smem:[#allocation7_spill]] %s1090_s24  ;;  %s1204_s27 = sadd.s32 1, %s1090_s24  }
   0x9   : > { %1438 = sst [smem:[#allocation8_spill]] %s1204_s27  ;;  %s357_s28 = sadd.s32 1, %s1086_s23 }
   0xa   : > { %s354_s29 = ssub.s32 %s1090_s24, %s1204_s27  ;;  %p367_p0 = scmp.ne.s32.totalorder %s1086_s23, %s1082_s22 }
   0xb   : > { %p355_p1 = scmp.eq.s32.totalorder %s354_s29, 0  ;;  %p368_p2 = scmp.eq.s32.totalorder %s1200_s25, 1 }
   0xc   : > { %p373_p3 = scmp.ne.s32.totalorder %s1082_s22, %s1078_s21  ;;  %p374_p4 = scmp.eq.s32.totalorder %s951_s26, 1 }
   0xd   : > { %s1215_s30 = scalar_select %p355_p1, %s1086_s23, %s357_s28  }
   0xe   : > { %p1217_p5 = por %p368_p2, %p367_p0  ;;  %p1221_p6 = por %p374_p4, %p373_p3 }
   0xf   : > { %1439 = sst [smem:[#allocation9_spill]] %s1215_s30  ;;  %p954_p7 = scmp.ge.s32.totalorder %s1090_s24, 1 }
  0x10   : > { %s1441_s17 = scalar_select %p1221_p6, 1, 0 }
  0x11   : > { %p467_p8 = scmp.lt.s32.totalorder %s1090_s24, 3 }
  0x12   : > { %1442 = sst [smem:[#allocation10_spill]] %s1441_s17 }
  0x13   : > { %p468_p9 = pnand %p954_p7, %p467_p8 }
  0x14   : > { %s1443_s1 = sld [smem:[#allocation12_spill]] (!%p468_p9)  ;;  %p520_p10 = scmp.lt.s32.totalorder (!%p468_p9), %s1200_s25, 1 }
  0x15   : > { %471 = sbr.rel (%p468_p9) target bundleno = 1135 (0x46f), region = 80  ;;  %s1444_s29 = sld [smem:[#allocation11_spill]] (!%p468_p9) }
  0x16   : > { %s1092_s19 = smov (!%p468_p9), 120   ;;  %s1093_s20 = smov (!%p468_p9), 4  }
  0x17   : > { %s969_s23 = sshll.u32 (!%p468_p9), %s1200_s25, 3 }
  0x1a   : > { %v535_v0 = vld [vmem:[%s1443_s1 + $0x30] sm:$0xff]  ;;  %v534_v1 = vld [vmem:[%s1443_s1 + $0x28] sm:$0xff]  ;;  %v533_v2 = vld [vmem:[%s1443_s1 + $0x20] sm:$0xff]  ;;  %s1238_s30 = scalar_select %p520_p10, %s1200_s25, 1  ;;  %vm540_vm0 = vcmask 457728   ;;  %vm602_vm1 = vcmask 64512  }
  0x1b   : > { %553 = vmatpush.msra.mxu0 %v535_v0  ;;  %v571_v3 = vld [vmem:[%s1413_s3 + $0x30] sm:$0xff]  ;;  %v570_v4 = vld [vmem:[%s1413_s3 + $0x28] sm:$0xff]  ;;  %v532_v5 = vld [vmem:[%s1443_s1 + $0x18] sm:$0xff]  ;;  %vm706_vm6 = vcmask 1043456   ;;  %vm702_vm11 = vcmask 31744   ;;  %vm748_vm12 = vcmask 818176  }
  0x1c   : > { %588 = vmatpush.msra.mxu1 %v571_v3  ;;  %v531_v6 = vld [vmem:[%s1443_s1 + $0x10] sm:$0xff]  ;;  %s956_s17 = sshll.u32 %s1238_s30, 3  ;;  %v569_v7 = vld [vmem:[%s1413_s3 + $0x20] sm:$0xff]  ;;  %v568_v8 = vld [vmem:[%s1413_s3 + $0x18] sm:$0xff]  ;;  %vm837_vm13 = vcmask 7168   ;;  %s511_s30 = sand.u32 1, %s1082_s22  }
  0x1d   : > { %554 = vmatpush.msra.mxu0 %v534_v1  ;;  %v530_v9 = vld [vmem:[%s1443_s1 + $0x8] sm:$0xff]  ;;  %s523_s24 = scalar_lea.vmem %s1444_s29, %s956_s17  ;;  %v529_v10 = vld [vmem:[%s1443_s1] sm:$0xff]  ;;  %v567_v12 = vld [vmem:[%s1413_s3 + $0x10] sm:$0xff]  ;;  %s846_s25 = scalar_lea.sflag [#allocation3], %s511_s30 }
  0x1e   : > { %589 = vmatpush.msra.mxu1 %v570_v4  ;;  %v528_v11 = vld [vmem:[%s523_s24] sm:$0xff]  ;;  %v566_v13 = vld [vmem:[%s1413_s3 + $0x8] sm:$0xff]  ;;  %v742_v47 = vld [vmem:[%s1420_s10 + $0x58] sm:$0xff]  ;;  %s527_s24 = scalar_lea.vmem %s1426_s16, %s956_s17  ;;  %s955_s17 = sshll.u32 %s511_s30, 3 }
  0x1f   : > { %555 = vmatpush.msra.mxu0 %v533_v2  ;;  %v565_v14 = vld [vmem:[%s1413_s3] sm:$0xff]  ;;  %v741_v49 = vld [vmem:[%s1420_s10 + $0x50] sm:$0xff]  ;;  %v740_v50 = vld [vmem:[%s1420_s10 + $0x48] sm:$0xff] }
  0x20   : > { %590 = vmatpush.msra.mxu1 %v569_v7  ;;  %v1013_v15 = vld [vmem:[%s1412_s2] ss:$0 sm:$0xff]  ;;  %v738_v52 = vld [vmem:[%s1420_s10 + $0x38] sm:$0xff]  ;;  %v737_v55 = vld [vmem:[%s1420_s10 + $0x30] sm:$0xff] }
  0x21   : > { %556 = vmatpush.msra.mxu0 %v532_v5  ;;  %v601_v19 = vld [vmem:[%s1415_s5] sm:$0xff]  ;;  %v736_v57 = vld [vmem:[%s1420_s10 + $0x28] sm:$0xff]  ;;  %v734_v63 = vld [vmem:[%s1420_s10 + $0x18] sm:$0xff] }
  0x22   : > { %591 = vmatpush.msra.mxu1 %v568_v8  ;;  %621 = vmatpush.msra.mxu2 %v601_v19  ;;  %v1014_v20 = vld [vmem:[%s1414_s4] ss:$0 sm:$0xff]  ;;  %v733_v7 = vld [vmem:[%s1420_s10 + $0x10] sm:$0xff]  ;;  %v732_v8 = vld [vmem:[%s1420_s10 + $0x8] sm:$0xff] }
  0x23   : > { %557 = vmatpush.msra.mxu0 %v531_v6  ;;  %v667_v25 = vld [vmem:[%s1416_s6] sm:$0xff] }
  0x24   : > { %592 = vmatpush.msra.mxu1 %v567_v12  ;;  %v697_v42 = vld [vmem:[%s1418_s8] sm:$0xf] }
  0x25   : > { %558 = vmatpush.msra.mxu0 %v530_v9  ;;  %962 = vmatpush.msk.msrb.mxu2 %vm706_vm6, %v697_v42  ;;  %v799_v43 = vld [vmem:[%s1422_s12] sm:$0xf] }
  0x26   : > { %593 = vmatpush.msra.mxu1 %v566_v13  ;;  %v743_v46 = vld [vmem:[%s1420_s10 + $0x60] sm:$0xf] }
  0x27   : > { %559 = vmatpush.msra.mxu0 %v529_v10  ;;  %964 = vmatpush.msk.msra.mxu3 %vm706_vm6, %v743_v46  ;;  %v739_v51 = vld [vmem:[%s1420_s10 + $0x40] sm:$0xff] }
  0x28   : > { %958 = vmatmul.msk.f32.vlgmr.msra.gmra.mxu0 %vm540_vm0, %v528_v11  ;;  %594 = vmatpush.msra.mxu1 %v565_v14  ;;  %v735_v61 = vld [vmem:[%s1420_s10 + $0x20] sm:$0xff] }
  0x29   : > { %686 = vmatpush.msrb.mxu0 %v667_v25  ;;  %759 = vmatpush.msra.mxu3 %v742_v47  ;;  %v1015_v2 = vld [vmem:[%s1417_s7] ss:$0 sm:$0xff] }
  0x2a   : > { %v731_v9 = vld [vmem:[%s1420_s10] sm:$0xff] }
  0x2b   : > { %760 = vmatpush.msra.mxu3 %v741_v49  ;;  %v1016_v10 = vld [vmem:[%s1419_s9] ss:$0 sm:$0xff] }
  0x2c   : > { %v1017_v14 = vld [vmem:[%s1423_s13] ss:$0 sm:$0xff] }
  0x2d   : > { %761 = vmatpush.msra.mxu3 %v740_v50 }
  0x2f   : > { %762 = vmatpush.msra.mxu3 %v739_v51 }
  0x31   : > { %763 = vmatpush.msra.mxu3 %v738_v52 }
  0x33   : > { %764 = vmatpush.msra.mxu3 %v737_v55 }
  0x35   : > { %765 = vmatpush.msra.mxu3 %v736_v57 }
  0x37   : > { %766 = vmatpush.msra.mxu3 %v735_v61 }
  0x39   : > { %767 = vmatpush.msra.mxu3 %v734_v63 }
  0x3b   : > { %768 = vmatpush.msra.mxu3 %v733_v7 }
  0x3d   : > { %769 = vmatpush.msra.mxu3 %v732_v8 }
  0x3f   : > { %770 = vmatpush.msra.mxu3 %v731_v9 }
  0xa5   : > { %v561_v16 = vpop.f32.mrf.mxu0 }
  0xa6   : > { %v1283_v17 = vadd.f32 %v1013_v15, %v561_v16 }
  0xa8   : > { %v564_v18 = vmax.f32 %v1283_v17, 0.0 }
  0xaa   : > { %959 = vmatmul.msk.f32.vlgmr.msra.gmra.mxu1 %vm540_vm0, %v564_v18 }
 0x127   : > { %v596_v21 = vpop.f32.mrf.mxu1 }
 0x128   : > { %v597_v22 = vadd.f32 %v1014_v20, %v596_v21  ;;  %v1018_v20 = vld [vmem:[%s1424_s14] ss:$0 sm:$0xff] }
 0x12a   : > { %v599_v23 = vmax.f32 %v597_v22, 0.0  ;;  %663 = vrot.lane.b32.xlu0 %v597_v22, %s1092_s19  ;;  %s860_s19 = scalar_lea.hbm %s1425_s15, %s969_s23  ;;  %s1048_s23 = scalar_lea.hbm %s1425_s15, 16 }
 0x12b   : > { %s864_s28 = sshll.u32 %s860_s19, 4  ;;  %s865_s28 = int_to_ptr.hbm [resolvable:$true] %s864_s28 }
 0x12c   : > { %v1295_v24 = vadd.f32 1.0, %v599_v23 }
 0x12e   : > { %960 = vmatmul.msk.f32.vlgmr.msra.gmra.mxu2 %vm602_vm1, %v1295_v24 }
 0x12f   : > { %966 = vmatpush.msk.msra.mxu2 %vm706_vm6, %v799_v43 }
 0x19c   : > { %v664_v39 = vpop.permute.xlu0 %663 }
 0x1b1   : > { %v623_v26 = vpop.f32.mrf.mxu2 }
 0x1b2   : > { %1020 = vrcp.f32 %v623_v26  ;;  %v637_v30 = vand.u32 2147483648, %v623_v26  ;;  %v635_v32 = vand.u32 2147483647, %v623_v26  ;;  %vm631_vm3 = vweird.f32 %v623_v26 }
 0x1b4   : > { %v638_v34 = vor.u32 1.1754944e-38, %v637_v30  ;;  %vm636_vm5 = vcmp.eq.f32.partialorder %v635_v32, 8.507059e+37 }
 0x1b8   : > { %v1021_v27 = vpop.eup %1020 }
 0x1b9   : > { %v627_v28 = vmul.f32 %v1021_v27, %v623_v26  ;;  %vm632_vm2 = vweird.f32 %v1021_v27 }
 0x1ba   : > { %vm633_vm4 = vmor %vm631_vm3, %vm632_vm2  ;;  %vm843_vm2 = vcmask 97312  }
 0x1bb   : > { %v628_v29 = vsub.f32 1.0, %v627_v28 }
 0x1bd   : > { %v629_v31 = vmul.f32 %v1021_v27, %v628_v29 }
 0x1bf   : > { %v630_v33 = vadd.f32 %v1021_v27, %v629_v31 }
 0x1c1   : > { %v634_v35 = vsel %vm633_vm4, %v1021_v27, %v630_v33 }
 0x1c2   : > { %v639_v36 = vsel %vm636_vm5, %v638_v34, %v634_v35 }
 0x1c3   : > { %v640_v37 = vmul.f32 4.0, %v639_v36 }
 0x1c5   : > { %v641_v38 = vsub.f32 1.0, %v640_v37 }
 0x1c7   : > { %v642_v40 = vsel %vm602_vm1, %v641_v38, 0.0  ;;  %v666_v41 = vmul.f32 %v664_v39, %v641_v38 }
 0x1c8   : > { %643 = vadd.xlane.f32.xlu0 %v642_v40 }
 0x1c9   : > { %961 = vmatmul.msk.f32.vlgmr.msrb.gmra.mxu0 %vm602_vm1, %v666_v41 }
 0x23b   : > { %v644_v44 = vpop.xlane.xlu0 %643 }
 0x23c   : > { %v645_v45 = vmul.f32 0.25, %v644_v44 }
 0x23e   : > { %v646_v48 = vmax.f32 %v645_v45, 1e-05 }
 0x240   : > { %1022 = vrcp.f32 %v646_v48  ;;  %v658_v58 = vand.u32 2147483648, %v646_v48  ;;  %v656_v60 = vand.u32 2147483647, %v646_v48  ;;  %vm652_vm8 = vweird.f32 %v646_v48 }
 0x242   : > { %v659_v0 = vor.u32 1.1754944e-38, %v658_v58  ;;  %vm657_vm10 = vcmp.eq.f32.partialorder %v656_v60, 8.507059e+37 }
 0x246   : > { %v1023_v53 = vpop.eup %1022  ;;  %v688_v4 = vpop.f32.mrf.mxu0 }
 0x247   : > { %v648_v54 = vmul.f32 %v1023_v53, %v646_v48  ;;  %vm653_vm7 = vweird.f32 %v1023_v53 }
 0x248   : > { %vm654_vm9 = vmor %vm652_vm8, %vm653_vm7 }
 0x249   : > { %v649_v56 = vsub.f32 1.0, %v648_v54 }
 0x24b   : > { %v650_v59 = vmul.f32 %v1023_v53, %v649_v56 }
 0x24d   : > { %v651_v62 = vadd.f32 %v1023_v53, %v650_v59 }
 0x24f   : > { %v655_v1 = vsel %vm654_vm9, %v1023_v53, %v651_v62 }
 0x250   : > { %v660_v3 = vsel %vm657_vm10, %v659_v0, %v655_v1 }
 0x251   : > { %v691_v5 = vmul.f32 %v688_v4, %v660_v3 }
 0x253   : > { %v696_v6 = vadd.f32 %v1015_v2, %v691_v5 }
 0x255   : > { %963 = vmatmul.msk.f32.vlgmr.msrb.gmra.mxu2 %vm702_vm11, %v696_v6 }
 0x25d   : > { %967 = vmatmul.msk.f32.vlgmr.msra.gmra.mxu2 %vm702_vm11, %v696_v6 }
 0x2d8   : > { %v727_v11 = vpop.f32.mrf.mxu2 }
 0x2d9   : > { %v728_v12 = vadd.f32 %v1016_v10, %v727_v11 }
 0x2db   : > { %v730_v13 = vmax.f32 %v728_v12, 0.0 }
 0x2dd   : > { %965 = vmatmul.msk.f32.vlgmr.msra.gmra.mxu3 %vm748_vm12, %v730_v13 }
 0x2e0   : > { %v824_v15 = vpop.f32.mrf.mxu2 }
 0x2e1   : > { %v825_v16 = vadd.f32 %v1017_v14, %v824_v15 }
 0x2e3   : > { %v827_v19 = vsub.f32 %v825_v16, %v564_v18  ;;  %v1019_v18 = vld [vmem:[%s1421_s11] ss:$0 sm:$0xff] }
 0x2e5   : > { %v828_v21 = vmul.f32 %v827_v19, %v827_v19 }
 0x2e7   : > { %v833_v22 = vmul.f32 %v1018_v20, %v828_v21 }
 0x2e9   : > { %v834_v23 = vsel %vm540_vm0, %v833_v22, 0.0 }
 0x2ea   : > { %835 = vadd.xlane.f32.xlu2 %v834_v23 }
 0x302   : > { %840 = vrot.lane.b32.xlu2 %v1295_v24, %s1093_s20  ;;  %s513_s20 = scalar_lea.vmem [#allocation2], %s955_s17 }
 0x303   : > { %s862_s26 = sshll.u32 %s513_s20, 4  ;;  %s863_s26 = int_to_ptr.vmem [resolvable:$true] %s862_s26 }
 0x35d   : > { %v836_v17 = vpop.xlane.xlu2 %835 }
 0x35e   : > { %838 = vst.msk [vmem:[%s527_s24] sm:$0xff] %vm837_vm13, %v836_v17  ;;  %s1042_s24 = sshra.s32 %s865_s28, 4  ;;  %s1043_s24 = int_to_ptr.hbm [resolvable:$true] %s1042_s24 }
 0x35f   : > { %s1044_s29 = scalar_lea.hbm %s1043_s24, 8  ;;  %p1049_p0 = scmp.lt.s32.totalorder %s1043_s24, %s1425_s15 }
 0x360   : > { %v772_v25 = vpop.f32.mrf.mxu3  ;;  %p1045_p11 = scmp.ne.s32.totalorder %s1043_s24, %s1044_s29  ;;  %p1050_p1 = scmp.lt.s32.totalorder %s1048_s23, %s1044_s29 }
 0x361   : > { %v773_v26 = vadd.f32 %v1019_v18, %v772_v25 }
 0x362   : > { %p1046_p12 = pnand %p1045_p11, %p1217_p5  ;;  %p1051_p2 = por %p1050_p1, %p1049_p0 }
 0x363   : > { %v775_v27 = vsel %vm702_vm11, %v773_v26, -inf }
 0x364   : > { %776 = vmax.xlane.f32.xlu1 %v775_v27  ;;  %p1047_p13 = pneg %p1046_p12 }
 0x365   : > { %v841_v44 = vpop.permute.xlu2 %840 }
 0x366   : > { %p1052_p3 = pnand %p1051_p2, %p1047_p13 }
 0x3d7   : > { %v777_v24 = vpop.xlane.xlu1 %776 }
 0x3d8   : > { %v778_v28 = vsub.f32 %v773_v26, %v777_v24 }
 0x3da   : > { %v779_v29 = vmul.f32 1.442695, %v778_v28 }
 0x3dc   : > { %1024 = vpow2.f32 %v779_v29 }
 0x3e2   : > { %v1025_v30 = vpop.eup %1024 }
 0x3e3   : > { %v781_v31 = vsel %vm702_vm11, %v1025_v30, 0.0 }
 0x3e4   : > { %782 = vadd.xlane.f32.xlu1 %v781_v31 }
 0x457   : > { %v783_v32 = vpop.xlane.xlu1 %782 }
 0x458   : > { %1026 = vrcp.f32 %v783_v32  ;;  %v795_v36 = vand.u32 2147483648, %v783_v32  ;;  %v793_v38 = vand.u32 2147483647, %v783_v32  ;;  %vm789_vm15 = vweird.f32 %v783_v32 }
 0x45a   : > { %v796_v40 = vor.u32 1.1754944e-38, %v795_v36  ;;  %vm794_vm1 = vcmp.eq.f32.partialorder %v793_v38, 8.507059e+37 }
 0x45e   : > { %v1027_v33 = vpop.eup %1026 }
 0x45f   : > { %v785_v34 = vmul.f32 %v1027_v33, %v783_v32  ;;  %vm790_vm14 = vweird.f32 %v1027_v33 }
 0x460   : > { %vm791_vm0 = vmor %vm789_vm15, %vm790_vm14 }
 0x461   : > { %v786_v35 = vsub.f32 1.0, %v785_v34 }
 0x463   : > { %v787_v37 = vmul.f32 %v1027_v33, %v786_v35 }
 0x465   : > { %v788_v39 = vadd.f32 %v1027_v33, %v787_v37 }
 0x467   : > { %v792_v41 = vsel %vm791_vm0, %v1027_v33, %v788_v39 }
 0x468   : > { %v797_v42 = vsel %vm794_vm1, %v796_v40, %v792_v41 }
 0x469   : > { %v798_v43 = vmul.f32 %v1025_v30, %v797_v42 }
 0x46b   : > { %839 = vst.msk [vmem:[%s513_s20] sm:$0xff] %vm702_vm11, %v798_v43 }
 0x46c   : > { %844 = vst.msk [vmem:[%s513_s20] sm:$0xff] %vm843_vm2, %v841_v44 }
 0x46d   : > { %1055 = shalt.err (!%p1052_p3)
}
 0x46e   : > { %972 = dma.vmem_to_hbm [thread:$0]  (%p1217_p5), %s863_s26, 128, %s865_s28, %s846_s25  }
 0x46f PF: > { %s1445_s30 = sld [smem:[#allocation7_spill]] }
 0x470   : > { %s1446_s19 = sld [smem:[#allocation5_spill]] }
 0x475   : > { %p978_p4 = scmp.ge.s32.totalorder %s1445_s30, 2 }
 0x476   : > { %s879_s1 = sand.u32 1, %s1446_s19  }
 0x477   : > { %p975_p7 = pnand %p978_p4, %p1221_p6  ;;  %s880_s21 = scalar_lea.sflag [#allocation3], %s879_s1 }
 0x479   : > { %p976_p8 = pneg %p975_p7 }
 0x47b   : > { %1073 = dma.done.wait (%p976_p8), %s880_s21, 128  }
 0x47c   : > { %1075 = vsyncadd (%p976_p8), %s880_s21, 4294967168  ;;  %s1448_s24 = sld [smem:[#allocation8_spill]]  ;;  %s1451_s21 = smov %s1082_s22 }
 0x47d   : > { %s1449_s29 = sld [smem:[#allocation6_spill]] }
 0x47e   : > { %s1450_s23 = sld [smem:[#allocation9_spill]] }
 0x482   : > { %p27_p9 = scmp.ge.s32.totalorder %s1448_s24, 4  }
 0x483   : > { %s1452_s22 = smov %s1449_s29 }
 0x484   :  { %29 = sbr.rel (!%p27_p9) target bundleno = 6 (0x6), region = 127 }
 0x489   :  { %893 = vsyncpa [#allocation3], 1 }
 0x48a   :  { %895 = vsyncpa [#allocation3 + $0x1], 1 }

</bundles_post_ra>
